<compile_context>
chip_gen: v5e
topology: v5e:2x2
jax: 0.10.0
libtpu: 0.0.40
codegen_flags: <defaults>
</compile_context>

<pallas_src>
import functools

import jax
import jax.numpy as jnp
from jax.experimental import pallas as pl
from jax.experimental.pallas import tpu as pltpu


def _round_up(x: int, m: int) -> int:
    return (x + m - 1) // m * m


# --------------------------- slab geometry --------------------------------- #
def make_geometry(obs_size, action_size, obs_embed, act_embed, latent_dim,
                  hidden, batch):
    """Row offsets (all multiples of 8) for every block in the two slabs."""
    h1, h2 = hidden
    in_dim = obs_embed + act_embed + latent_dim
    bp = _round_up(batch, 8)                 # padded batch / bias replication
    # parameter slab rows
    r_ws = 0
    r_wa = _round_up(r_ws + obs_size, 8)
    r_w1 = _round_up(r_wa + action_size, 8)
    r_w2 = _round_up(r_w1 + in_dim, 8)
    r_wmu = _round_up(r_w2 + h1, 8)
    r_wlv = _round_up(r_wmu + h2, 8)
    r_bs = _round_up(r_wlv + h2, 8)          # biases: 8-row-aligned, replicated bp x
    r_ba = r_bs + bp
    r_b1 = r_ba + bp
    r_b2 = r_b1 + bp
    r_bmu = r_b2 + bp
    r_blv = r_bmu + bp
    n_rows = _round_up(r_blv + bp, 8)
    n_cols = max(obs_embed, act_embed, h1, h2, obs_size)
    # activation slab columns (s | a | latent | eps share the lane extent)
    act_cols = max(obs_size, action_size, latent_dim)
    return dict(
        obs_size=obs_size, action_size=action_size,
        obs_embed=obs_embed, act_embed=act_embed, latent_dim=latent_dim,
        h1=h1, h2=h2, batch=batch, bp=bp,
        r_ws=r_ws, r_wa=r_wa, r_w1=r_w1, r_w2=r_w2, r_wmu=r_wmu, r_wlv=r_wlv,
        r_bs=r_bs, r_ba=r_ba, r_b1=r_b1, r_b2=r_b2, r_bmu=r_bmu, r_blv=r_blv,
        n_rows=n_rows, n_cols=n_cols, act_cols=act_cols,
    )


# ----------------------------- Pallas kernel -------------------------------- #
def _state_network_kernel(
    act_ref, p_ref, out_ref, *,
    bp, obs_size, action_size, obs_embed, act_embed, latent_dim, h1, h2,
    r_ws, r_wa, r_w1, r_w2, r_wmu, r_wlv, r_bs, r_ba, r_b1, r_b2, r_bmu, r_blv,
):
    f32 = jnp.float32

    # ---- 8-row-aligned views into the packed ACTIVATION slab ----
    s_in = act_ref[0 * bp:0 * bp + bp, 0:obs_size]
    a_in = act_ref[1 * bp:1 * bp + bp, 0:action_size]
    z_in = act_ref[2 * bp:2 * bp + bp, 0:latent_dim]
    eps = act_ref[3 * bp:3 * bp + bp, 0:obs_size]

    # ---- static views into the packed PARAMETER slab ----
    ws = p_ref[r_ws:r_ws + obs_size, 0:obs_embed]
    wa = p_ref[r_wa:r_wa + action_size, 0:act_embed]
    w1_s = p_ref[r_w1:r_w1 + obs_embed, 0:h1]
    w1_a = p_ref[r_w1 + obs_embed:r_w1 + obs_embed + act_embed, 0:h1]
    w1_z = p_ref[r_w1 + obs_embed + act_embed:
                 r_w1 + obs_embed + act_embed + latent_dim, 0:h1]
    w2 = p_ref[r_w2:r_w2 + h1, 0:h2]
    wmu = p_ref[r_wmu:r_wmu + h2, 0:obs_size]
    wlv = p_ref[r_wlv:r_wlv + h2, 0:obs_size]

    # biases were replicated bp times at pack time -> full aligned tiles,
    # plain VALU adds (no sublane extraction, no broadcast_in_dim).
    bs = p_ref[r_bs:r_bs + bp, 0:obs_embed]
    ba = p_ref[r_ba:r_ba + bp, 0:act_embed]
    b1 = p_ref[r_b1:r_b1 + bp, 0:h1]
    b2 = p_ref[r_b2:r_b2 + bp, 0:h2]
    bmu = p_ref[r_bmu:r_bmu + bp, 0:obs_size]
    blv = p_ref[r_blv:r_blv + bp, 0:obs_size]

    # ---- feature extractors: relu(Linear(.)) ----
    s_emb = jnp.maximum(jnp.dot(s_in, ws, preferred_element_type=f32) + bs, 0.0)
    a_emb = jnp.maximum(jnp.dot(a_in, wa, preferred_element_type=f32) + ba, 0.0)

    # ---- decoder MLP; concat replaced by split-weight accumulation ----
    h = (jnp.dot(s_emb, w1_s, preferred_element_type=f32)
         + jnp.dot(a_emb, w1_a, preferred_element_type=f32)
         + jnp.dot(z_in, w1_z, preferred_element_type=f32)
         + b1)
    h = jnp.maximum(h, 0.0)                                 # ReLU (hidden)
    h = jnp.dot(h, w2, preferred_element_type=f32) + b2     # Identity (output)

    # ---- mu / logvar heads (separate matmuls -> both lane-aligned at col 0) ----
    mu = jnp.dot(h, wmu, preferred_element_type=f32) + bmu
    logvar = jnp.dot(h, wlv, preferred_element_type=f32) + blv

    std = jnp.exp(0.5 * logvar)
    sample = eps * std + mu          # reparameterized gaussian sample

    # ---- four 8-row-aligned row-block stores (no lane concat) ----
    out_ref[0 * bp:1 * bp, :] = mu
    out_ref[1 * bp:2 * bp, :] = logvar
    out_ref[2 * bp:3 * bp, :] = sample
    out_ref[3 * bp:4 * bp, :] = std


# ------------------------------- wrapper ------------------------------------ #
def state_network_forward(s, a, latent, eps, slab, geom):
    g = geom
    B = s.shape[0]
    bp = g["bp"]
    assert bp == _round_up(B, 8) and B == g["batch"]
    obs_size = g["obs_size"]
    in_dim = g["obs_embed"] + g["act_embed"] + g["latent_dim"]

    # Pack the four activation inputs into ONE row-blocked slab (one DMA).
    act = jnp.zeros((4 * bp, g["act_cols"]), jnp.float32)
    act = act.at[0 * bp:0 * bp + B, :obs_size].set(s)
    act = act.at[1 * bp:1 * bp + B, :g["action_size"]].set(a)
    act = act.at[2 * bp:2 * bp + B, :g["latent_dim"]].set(latent)
    act = act.at[3 * bp:3 * bp + B, :obs_size].set(eps)

    kernel = functools.partial(
        _state_network_kernel,
        bp=bp, obs_size=obs_size, action_size=g["action_size"],
        obs_embed=g["obs_embed"], act_embed=g["act_embed"],
        latent_dim=g["latent_dim"], h1=g["h1"], h2=g["h2"],
        r_ws=g["r_ws"], r_wa=g["r_wa"], r_w1=g["r_w1"], r_w2=g["r_w2"],
        r_wmu=g["r_wmu"], r_wlv=g["r_wlv"],
        r_bs=g["r_bs"], r_ba=g["r_ba"], r_b1=g["r_b1"], r_b2=g["r_b2"],
        r_bmu=g["r_bmu"], r_blv=g["r_blv"],
    )

    flops = 2 * bp * (obs_size * g["obs_embed"]
                      + g["action_size"] * g["act_embed"]
                      + in_dim * g["h1"]
                      + g["h1"] * g["h2"]
                      + 2 * g["h2"] * obs_size)
    bytes_accessed = 4 * (act.size + slab.size + 4 * bp * obs_size)
    cost = pl.CostEstimate(flops=flops,
                           transcendentals=bp * obs_size,
                           bytes_accessed=bytes_accessed)

    vmem_spec = pl.BlockSpec(memory_space=pltpu.MemorySpace.VMEM)

    packed = pl.pallas_call(
        kernel,
        out_shape=jax.ShapeDtypeStruct((4 * bp, obs_size), jnp.float32),
        in_specs=[vmem_spec, vmem_spec],
        out_specs=vmem_spec,
        cost_estimate=cost,
    )(act, slab)

    mu = packed[0 * bp:0 * bp + B, :]
    logvar = packed[1 * bp:1 * bp + B, :]
    sample = packed[2 * bp:2 * bp + B, :]
    std = packed[3 * bp:3 * bp + B, :]
    return mu, logvar, sample, std


# --------------------------- parameter init --------------------------------- #
def _linear_params(key, in_features, out_features):
    """PyTorch-style uniform(-1/sqrt(fan_in), 1/sqrt(fan_in)); weight as [in, out]."""
    kw, kb = jax.random.split(key)
    bound = 1.0 / jnp.sqrt(jnp.float32(in_features))
    w = jax.random.uniform(kw, (in_features, out_features), jnp.float32, -bound, bound)
    b = jax.random.uniform(kb, (1, out_features), jnp.float32, -bound, bound)
    return w, b


def init_params(key, obs_size, action_size, obs_embed, act_embed, latent_dim, hidden):
    keys = jax.random.split(key, 6)
    input_dim = obs_embed + act_embed + latent_dim
    ws, bs = _linear_params(keys[0], obs_size, obs_embed)
    wa, ba = _linear_params(keys[1], action_size, act_embed)
    w1, b1 = _linear_params(keys[2], input_dim, hidden[0])
    w2, b2 = _linear_params(keys[3], hidden[0], hidden[1])
    wmu, bmu = _linear_params(keys[4], hidden[1], obs_size)
    wlv, blv = _linear_params(keys[5], hidden[1], obs_size)
    return dict(ws=ws, bs=bs, wa=wa, ba=ba, w1=w1, b1=b1, w2=w2, b2=b2,
                wmu=wmu, bmu=bmu, wlv=wlv, blv=blv)


def pack_params(p, geom):
    """One-time packing of all weights/biases into a single lane-dense slab."""
    g = geom
    bp = g["bp"]
    slab = jnp.zeros((g["n_rows"], g["n_cols"]), jnp.float32)
    slab = slab.at[g["r_ws"]:g["r_ws"] + g["obs_size"], :g["obs_embed"]].set(p["ws"])
    slab = slab.at[g["r_wa"]:g["r_wa"] + g["action_size"], :g["act_embed"]].set(p["wa"])
    in_dim = g["obs_embed"] + g["act_embed"] + g["latent_dim"]
    slab = slab.at[g["r_w1"]:g["r_w1"] + in_dim, :g["h1"]].set(p["w1"])
    slab = slab.at[g["r_w2"]:g["r_w2"] + g["h1"], :g["h2"]].set(p["w2"])
    slab = slab.at[g["r_wmu"]:g["r_wmu"] + g["h2"], :g["obs_size"]].set(p["wmu"])
    slab = slab.at[g["r_wlv"]:g["r_wlv"] + g["h2"], :g["obs_size"]].set(p["wlv"])

    def rep(b):  # replicate (1, N) bias to a full aligned (bp, N) tile
        return jnp.tile(b, (bp, 1))

    slab = slab.at[g["r_bs"]:g["r_bs"] + bp, :g["obs_embed"]].set(rep(p["bs"]))
    slab = slab.at[g["r_ba"]:g["r_ba"] + bp, :g["act_embed"]].set(rep(p["ba"]))
    slab = slab.at[g["r_b1"]:g["r_b1"] + bp, :g["h1"]].set(rep(p["b1"]))
    slab = slab.at[g["r_b2"]:g["r_b2"] + bp, :g["h2"]].set(rep(p["b2"]))
    slab = slab.at[g["r_bmu"]:g["r_bmu"] + bp, :g["obs_size"]].set(rep(p["bmu"]))
    slab = slab.at[g["r_blv"]:g["r_blv"] + bp, :g["obs_size"]].set(rep(p["blv"]))
    return slab


# ----------------------------- reference ------------------------------------ #
def state_network_ref(s, a, latent, eps, p):
    s_emb = jax.nn.relu(s @ p["ws"] + p["bs"])
    a_emb = jax.nn.relu(a @ p["wa"] + p["ba"])
    x = jnp.concatenate([s_emb, a_emb, latent], axis=1)
    h = jax.nn.relu(x @ p["w1"] + p["b1"])
    h = h @ p["w2"] + p["b2"]
    mu = h @ p["wmu"] + p["bmu"]
    logvar = h @ p["wlv"] + p["blv"]
    std = jnp.exp(0.5 * logvar)
    sample = eps * std + mu
    return mu, logvar, sample, std


# -------------------------------- main --------------------------------------- #
if __name__ == "__main__":
    # Small CFG-equivalent hyperparameters.
    batch = 8
    obs_size = 16
    action_size = 8
    obs_embed_dim = 32
    action_embed_dim = 16
    latent_dim = 16
    decoder_hidden = [64, 32]

    # TODO(synk): FeatureExtractor output_size == 0 branch (returns an empty
    # tensor) is not implemented; embed dims are assumed > 0.

    key = jax.random.PRNGKey(0)
    k_param, k_s, k_a, k_z, k_eps = jax.random.split(key, 5)

    params = init_params(k_param, obs_size, action_size,
                         obs_embed_dim, action_embed_dim, latent_dim,
                         decoder_hidden)
    geom = make_geometry(obs_size, action_size,
                         obs_embed_dim, action_embed_dim, latent_dim,
                         decoder_hidden, batch)
    slab = pack_params(params, geom)

    s = jax.random.normal(k_s, (batch, obs_size), jnp.float32)
    a = jax.random.normal(k_a, (batch, action_size), jnp.float32)
    latent = jax.random.normal(k_z, (batch, latent_dim), jnp.float32)
    # Deterministic "torch.randn_like" noise for the reparameterization trick.
    eps = jax.random.normal(k_eps, (batch, obs_size), jnp.float32)

    mu, logvar, sample, std = jax.block_until_ready(
        state_network_forward(s, a, latent, eps, slab, geom)
    )

    mu_r, logvar_r, sample_r, std_r = state_network_ref(s, a, latent, eps, params)
    assert jnp.allclose(mu, mu_r, atol=1e-4, rtol=1e-4)
    assert jnp.allclose(logvar, logvar_r, atol=1e-4, rtol=1e-4)
    assert jnp.allclose(sample, sample_r, atol=1e-4, rtol=1e-4)
    assert jnp.allclose(std, std_r, atol=1e-4, rtol=1e-4)

    print("KERNEL_OK")
</pallas_src>

<mosaic_0001>
module attributes {stable_mosaic.version = 11 : i64} {
  func.func @_state_network_kernel(%arg0: memref<32x16xf32, #tpu.memory_space<vmem>>, %arg1: memref<264x64xf32, #tpu.memory_space<vmem>>, %arg2: memref<32x16xf32, #tpu.memory_space<vmem>>) attributes {dimension_semantics = [], scalar_prefetch = 0 : i64, scratch_operands = 0 : i64, tpu.core_type = #tpu.core_type<tc>} {
    %c0 = arith.constant 0 : index
    %c0_0 = arith.constant 0 : index
    %0 = vector.load %arg0[%c0, %c0_0] : memref<32x16xf32, #tpu.memory_space<vmem>>, vector<8x16xf32>
    %c8 = arith.constant 8 : index
    %c0_1 = arith.constant 0 : index
    %1 = vector.load %arg0[%c8, %c0_1] : memref<32x16xf32, #tpu.memory_space<vmem>>, vector<8x8xf32>
    %c16 = arith.constant 16 : index
    %c0_2 = arith.constant 0 : index
    %2 = vector.load %arg0[%c16, %c0_2] : memref<32x16xf32, #tpu.memory_space<vmem>>, vector<8x16xf32>
    %c24 = arith.constant 24 : index
    %c0_3 = arith.constant 0 : index
    %3 = vector.load %arg0[%c24, %c0_3] : memref<32x16xf32, #tpu.memory_space<vmem>>, vector<8x16xf32>
    %c0_4 = arith.constant 0 : index
    %c0_5 = arith.constant 0 : index
    %4 = vector.load %arg1[%c0_4, %c0_5] : memref<264x64xf32, #tpu.memory_space<vmem>>, vector<16x32xf32>
    %c16_6 = arith.constant 16 : index
    %c0_7 = arith.constant 0 : index
    %5 = vector.load %arg1[%c16_6, %c0_7] : memref<264x64xf32, #tpu.memory_space<vmem>>, vector<8x16xf32>
    %c24_8 = arith.constant 24 : index
    %c0_9 = arith.constant 0 : index
    %6 = vector.load %arg1[%c24_8, %c0_9] : memref<264x64xf32, #tpu.memory_space<vmem>>, vector<32x64xf32>
    %c56 = arith.constant 56 : index
    %c0_10 = arith.constant 0 : index
    %7 = vector.load %arg1[%c56, %c0_10] : memref<264x64xf32, #tpu.memory_space<vmem>>, vector<16x64xf32>
    %c72 = arith.constant 72 : index
    %c0_11 = arith.constant 0 : index
    %8 = vector.load %arg1[%c72, %c0_11] : memref<264x64xf32, #tpu.memory_space<vmem>>, vector<16x64xf32>
    %c88 = arith.constant 88 : index
    %c0_12 = arith.constant 0 : index
    %9 = vector.load %arg1[%c88, %c0_12] : memref<264x64xf32, #tpu.memory_space<vmem>>, vector<64x32xf32>
    %c152 = arith.constant 152 : index
    %c0_13 = arith.constant 0 : index
    %10 = vector.load %arg1[%c152, %c0_13] : memref<264x64xf32, #tpu.memory_space<vmem>>, vector<32x16xf32>
    %c184 = arith.constant 184 : index
    %c0_14 = arith.constant 0 : index
    %11 = vector.load %arg1[%c184, %c0_14] : memref<264x64xf32, #tpu.memory_space<vmem>>, vector<32x16xf32>
    %c216 = arith.constant 216 : index
    %c0_15 = arith.constant 0 : index
    %12 = vector.load %arg1[%c216, %c0_15] : memref<264x64xf32, #tpu.memory_space<vmem>>, vector<8x32xf32>
    %c224 = arith.constant 224 : index
    %c0_16 = arith.constant 0 : index
    %13 = vector.load %arg1[%c224, %c0_16] : memref<264x64xf32, #tpu.memory_space<vmem>>, vector<8x16xf32>
    %c232 = arith.constant 232 : index
    %c0_17 = arith.constant 0 : index
    %14 = vector.load %arg1[%c232, %c0_17] : memref<264x64xf32, #tpu.memory_space<vmem>>, vector<8x64xf32>
    %c240 = arith.constant 240 : index
    %c0_18 = arith.constant 0 : index
    %15 = vector.load %arg1[%c240, %c0_18] : memref<264x64xf32, #tpu.memory_space<vmem>>, vector<8x32xf32>
    %c248 = arith.constant 248 : index
    %c0_19 = arith.constant 0 : index
    %16 = vector.load %arg1[%c248, %c0_19] : memref<264x64xf32, #tpu.memory_space<vmem>>, vector<8x16xf32>
    %c256 = arith.constant 256 : index
    %c0_20 = arith.constant 0 : index
    %17 = vector.load %arg1[%c256, %c0_20] : memref<264x64xf32, #tpu.memory_space<vmem>>, vector<8x16xf32>
    %cst = arith.constant dense<0.000000e+00> : vector<8x32xf32>
    %18 = tpu.matmul %0, %4, %cst {dimension_numbers = #tpu.dot_dimension_numbers<[1], [0], [0], [1], [0, 0, 1, 1], [], []>} : vector<8x16xf32>, vector<16x32xf32>, vector<8x32xf32> -> vector<8x32xf32>
    %19 = arith.addf %18, %12 : vector<8x32xf32>
    %cst_21 = arith.constant 0.000000e+00 : f32
    %20 = vector.broadcast %cst_21 : f32 to vector<8x32xf32>
    %21 = arith.maximumf %19, %20 : vector<8x32xf32>
    %cst_22 = arith.constant dense<0.000000e+00> : vector<8x16xf32>
    %22 = tpu.matmul %1, %5, %cst_22 {dimension_numbers = #tpu.dot_dimension_numbers<[1], [0], [0], [1], [0, 0, 1, 1], [], []>} : vector<8x8xf32>, vector<8x16xf32>, vector<8x16xf32> -> vector<8x16xf32>
    %23 = arith.addf %22, %13 : vector<8x16xf32>
    %cst_23 = arith.constant 0.000000e+00 : f32
    %24 = vector.broadcast %cst_23 : f32 to vector<8x16xf32>
    %25 = arith.maximumf %23, %24 : vector<8x16xf32>
    %cst_24 = arith.constant dense<0.000000e+00> : vector<8x64xf32>
    %26 = tpu.matmul %21, %6, %cst_24 {dimension_numbers = #tpu.dot_dimension_numbers<[1], [0], [0], [1], [0, 0, 1, 1], [], []>} : vector<8x32xf32>, vector<32x64xf32>, vector<8x64xf32> -> vector<8x64xf32>
    %cst_25 = arith.constant dense<0.000000e+00> : vector<8x64xf32>
    %27 = tpu.matmul %25, %7, %cst_25 {dimension_numbers = #tpu.dot_dimension_numbers<[1], [0], [0], [1], [0, 0, 1, 1], [], []>} : vector<8x16xf32>, vector<16x64xf32>, vector<8x64xf32> -> vector<8x64xf32>
    %28 = arith.addf %26, %27 : vector<8x64xf32>
    %cst_26 = arith.constant dense<0.000000e+00> : vector<8x64xf32>
    %29 = tpu.matmul %2, %8, %cst_26 {dimension_numbers = #tpu.dot_dimension_numbers<[1], [0], [0], [1], [0, 0, 1, 1], [], []>} : vector<8x16xf32>, vector<16x64xf32>, vector<8x64xf32> -> vector<8x64xf32>
    %30 = arith.addf %28, %29 : vector<8x64xf32>
    %31 = arith.addf %30, %14 : vector<8x64xf32>
    %cst_27 = arith.constant 0.000000e+00 : f32
    %32 = vector.broadcast %cst_27 : f32 to vector<8x64xf32>
    %33 = arith.maximumf %31, %32 : vector<8x64xf32>
    %cst_28 = arith.constant dense<0.000000e+00> : vector<8x32xf32>
    %34 = tpu.matmul %33, %9, %cst_28 {dimension_numbers = #tpu.dot_dimension_numbers<[1], [0], [0], [1], [0, 0, 1, 1], [], []>} : vector<8x64xf32>, vector<64x32xf32>, vector<8x32xf32> -> vector<8x32xf32>
    %35 = arith.addf %34, %15 : vector<8x32xf32>
    %cst_29 = arith.constant dense<0.000000e+00> : vector<8x16xf32>
    %36 = tpu.matmul %35, %10, %cst_29 {dimension_numbers = #tpu.dot_dimension_numbers<[1], [0], [0], [1], [0, 0, 1, 1], [], []>} : vector<8x32xf32>, vector<32x16xf32>, vector<8x16xf32> -> vector<8x16xf32>
    %37 = arith.addf %36, %16 : vector<8x16xf32>
    %cst_30 = arith.constant dense<0.000000e+00> : vector<8x16xf32>
    %38 = tpu.matmul %35, %11, %cst_30 {dimension_numbers = #tpu.dot_dimension_numbers<[1], [0], [0], [1], [0, 0, 1, 1], [], []>} : vector<8x32xf32>, vector<32x16xf32>, vector<8x16xf32> -> vector<8x16xf32>
    %39 = arith.addf %38, %17 : vector<8x16xf32>
    %cst_31 = arith.constant 5.000000e-01 : f32
    %40 = vector.broadcast %cst_31 : f32 to vector<8x16xf32>
    %41 = arith.mulf %40, %39 : vector<8x16xf32>
    %42 = math.exp %41 : vector<8x16xf32>
    %43 = arith.mulf %3, %42 : vector<8x16xf32>
    %44 = arith.addf %43, %37 : vector<8x16xf32>
    %c0_32 = arith.constant 0 : index
    %c0_33 = arith.constant 0 : index
    %45 = vector.load %arg2[%c0_32, %c0_33] : memref<32x16xf32, #tpu.memory_space<vmem>>, vector<8x16xf32>
    tpu.vector_store %arg2[%c0_32, %c0_33], %37 {strides = array<i32>} : memref<32x16xf32, #tpu.memory_space<vmem>>, vector<8x16xf32>,
    %c8_34 = arith.constant 8 : index
    %c0_35 = arith.constant 0 : index
    %46 = vector.load %arg2[%c8_34, %c0_35] : memref<32x16xf32, #tpu.memory_space<vmem>>, vector<8x16xf32>
    tpu.vector_store %arg2[%c8_34, %c0_35], %39 {strides = array<i32>} : memref<32x16xf32, #tpu.memory_space<vmem>>, vector<8x16xf32>,
    %c16_36 = arith.constant 16 : index
    %c0_37 = arith.constant 0 : index
    %47 = vector.load %arg2[%c16_36, %c0_37] : memref<32x16xf32, #tpu.memory_space<vmem>>, vector<8x16xf32>
    tpu.vector_store %arg2[%c16_36, %c0_37], %44 {strides = array<i32>} : memref<32x16xf32, #tpu.memory_space<vmem>>, vector<8x16xf32>,
    %c24_38 = arith.constant 24 : index
    %c0_39 = arith.constant 0 : index
    %48 = vector.load %arg2[%c24_38, %c0_39] : memref<32x16xf32, #tpu.memory_space<vmem>>, vector<8x16xf32>
    tpu.vector_store %arg2[%c24_38, %c0_39], %42 {strides = array<i32>} : memref<32x16xf32, #tpu.memory_space<vmem>>, vector<8x16xf32>,
    return
  }
}

</mosaic_0001>

<bundles_post_ra>
// kernel: tpu_custom_call.1
= control target key start
LH: loop header
LB: loop body
LE: loop exit
PB: predicated region body
PF: predicated region fallthrough
CT: control target
= control target key end

     0   :  { %vm73_vm0 = vcmask 64512   ;;  %vm48_vm1 = vcmask 130048   ;;  %vm121_vm2 = vcmask 261120   ;;  %vm171_vm3 = vcmask 523264   ;;  %s409_s1 = inlined_call_operand.vmem [shape: f32[264,64], index: 1, kind: input, shape index: {}]   ;;  %s410_s0 = inlined_call_operand.vmem [shape: f32[32,16], index: 0, kind: input, shape index: {}]   ;;  %s411_s2 = inlined_call_operand.vmem [shape: f32[32,16], index: 2, kind: output, shape index: {}]  }
   0x1   :  { %v16_v0 = vld [vmem:[%s409_s1 + $0x8] sm:$0xff]  ;;  %v15_v1 = vld [vmem:[%s409_s1] sm:$0xff]  ;;  %v17_v2 = vld [vmem:[%s409_s1 + $0x10] sm:$0xff] }
   0x2   :  { %66 = vmatpush.msra.mxu0 %v16_v0  ;;  %92 = vmatpush.msra.mxu1 %v17_v2  ;;  %v11_v3 = vld [vmem:[%s410_s0] sm:$0xff]  ;;  %v12_v4 = vld [vmem:[%s410_s0 + $0x8] sm:$0xff]  ;;  %v21_v5 = vld [vmem:[%s409_s1 + $0x30] sm:$0xff] }
   0x3   :  { %252 = vmatmul.msk.f32.vlgmr.msra.gmra.mxu1 %vm73_vm0, %v12_v4  ;;  %137 = vmatpush.msra.mxu3 %v21_v5  ;;  %v20_v6 = vld [vmem:[%s409_s1 + $0x28] sm:$0xff]  ;;  %v23_v7 = vld [vmem:[%s409_s1 + $0x40] sm:$0xff]  ;;  %v22_v9 = vld [vmem:[%s409_s1 + $0x38] sm:$0xff] }
   0x4   :  { %67 = vmatpush.msra.mxu0 %v15_v1  ;;  %v19_v8 = vld [vmem:[%s409_s1 + $0x20] sm:$0xff]  ;;  %115 = vmatpush.msra.mxu2 %v23_v7  ;;  %v18_v10 = vld [vmem:[%s409_s1 + $0x18] sm:$0xff]  ;;  %v25_v11 = vld [vmem:[%s409_s1 + $0x50] sm:$0xff] }
   0x5   :  { %251 = vmatmul.msk.f32.vlgmr.msra.gmra.mxu0 %vm48_vm1, %v11_v3  ;;  %138 = vmatpush.msra.mxu3 %v20_v6  ;;  %v24_v12 = vld [vmem:[%s409_s1 + $0x48] sm:$0xff]  ;;  %v13_v13 = vld [vmem:[%s410_s0 + $0x10] sm:$0xff]  ;;  %v31_v16 = vld [vmem:[%s409_s1 + $0x80] sm:$0xff] }
   0x6   :  { %116 = vmatpush.msra.mxu2 %v22_v9  ;;  %162 = vmatpush.msrb.mxu1 %v25_v11  ;;  %v33_v14 = vld [vmem:[%s409_s1 + $0x90] sm:$0xff]  ;;  %v32_v15 = vld [vmem:[%s409_s1 + $0x88] sm:$0xff]  ;;  %v43_v17 = vld [vmem:[%s409_s1 + $0xe0] sm:$0xff] }
   0x7   :  { %139 = vmatpush.msra.mxu3 %v19_v8  ;;  %183 = vmatpush.msrb.mxu0 %v33_v14  ;;  %v42_v18 = vld [vmem:[%s409_s1 + $0xd8] sm:$0xff]  ;;  %v29_v26 = vld [vmem:[%s409_s1 + $0x70] sm:$0xff]  ;;  %v28_v27 = vld [vmem:[%s409_s1 + $0x68] sm:$0xff] }
   0x8   :  { %163 = vmatpush.msrb.mxu1 %v24_v12  ;;  %v30_v25 = vld [vmem:[%s409_s1 + $0x78] sm:$0xff]  ;;  %v27_v28 = vld [vmem:[%s409_s1 + $0x60] sm:$0xff]  ;;  %v41_v30 = vld [vmem:[%s409_s1 + $0xd0] sm:$0xff] }
   0x9   :  { %140 = vmatpush.msra.mxu3 %v18_v10  ;;  %184 = vmatpush.msrb.mxu0 %v32_v15  ;;  %v26_v29 = vld [vmem:[%s409_s1 + $0x58] sm:$0xff]  ;;  %v37_v31 = vld [vmem:[%s409_s1 + $0xb0] sm:$0xff]  ;;  %v40_v32 = vld [vmem:[%s409_s1 + $0xc8] sm:$0xff] }
   0xa   :  { %210 = vmatpush.msrb.mxu2 %v37_v31  ;;  %v36_v33 = vld [vmem:[%s409_s1 + $0xa8] sm:$0xff]  ;;  %v39_v34 = vld [vmem:[%s409_s1 + $0xc0] sm:$0xff]  ;;  %v38_v44 = vld [vmem:[%s409_s1 + $0xb8] sm:$0xff] }
   0xb   :  { %255 = vmatmul.msk.f32.vlgmr.msrb.gmra.mxu1 %vm48_vm1, %v13_v13  ;;  %185 = vmatpush.msrb.mxu0 %v31_v16  ;;  %v44_v39 = vld [vmem:[%s409_s1 + $0xe8] sm:$0xff]  ;;  %v35_v43 = vld [vmem:[%s409_s1 + $0xa0] sm:$0xff]  ;;  %v34_v45 = vld [vmem:[%s409_s1 + $0x98] sm:$0xff] }
   0xc   :  { %230 = vmatpush.msrb.mxu3 %v41_v30  ;;  %211 = vmatpush.msrb.mxu2 %v36_v33  ;;  %v45_v46 = vld [vmem:[%s409_s1 + $0xf0] sm:$0xff]  ;;  %v46_v49 = vld [vmem:[%s409_s1 + $0xf8] sm:$0xff]  ;;  %v47_v50 = vld [vmem:[%s409_s1 + $0x100] sm:$0xff] }
   0xd   :  { %186 = vmatpush.msrb.mxu0 %v30_v25  ;;  %v14_v57 = vld [vmem:[%s410_s0 + $0x18] sm:$0xff] }
   0xe   :  { %231 = vmatpush.msrb.mxu3 %v40_v32  ;;  %212 = vmatpush.msrb.mxu2 %v35_v43 }
   0xf   :  { %187 = vmatpush.msrb.mxu0 %v29_v26 }
  0x10   :  { %232 = vmatpush.msrb.mxu3 %v39_v34  ;;  %213 = vmatpush.msrb.mxu2 %v34_v45 }
  0x11   :  { %188 = vmatpush.msrb.mxu0 %v28_v27 }
  0x12   :  { %233 = vmatpush.msrb.mxu3 %v38_v44 }
  0x13   :  { %189 = vmatpush.msrb.mxu0 %v27_v28 }
  0x15   :  { %190 = vmatpush.msrb.mxu0 %v26_v29 }
  0x80   :  { %v94_v19 = vpop.f32.mrf.mxu1 }
  0x81   :  { %v95_v20 = vadd.f32 %v94_v19, %v43_v17 }
  0x82   :  { %v69_v21 = vpop.f32.mrf.mxu0 }
  0x83   :  { %v70_v22 = vadd.f32 %v69_v21, %v42_v18  ;;  %v97_v23 = vmax.f32 %v95_v20, 0.0 }
  0x85   :  { %v72_v24 = vmax.f32 %v70_v22, 0.0  ;;  %253 = vmatmul.msk.f32.vlgmr.msra.gmra.mxu2 %vm48_vm1, %v97_v23 }
  0x87   :  { %254 = vmatmul.msk.f32.vlgmr.msra.gmra.mxu3 %vm121_vm2, %v72_v24 }
  0x88   :  { %v165_v37 = vpop.f32.mrf.mxu1 }
 0x108   :  { %v118_v35 = vpop.f32.mrf.mxu2 }
 0x10a   :  { %v142_v36 = vpop.f32.mrf.mxu3 }
 0x10b   :  { %v143_v38 = vadd.f32 %v142_v36, %v118_v35 }
 0x10d   :  { %v168_v40 = vadd.f32 %v165_v37, %v143_v38 }
 0x10f   :  { %v169_v41 = vadd.f32 %v168_v40, %v44_v39 }
 0x111   :  { %v170_v42 = vmax.f32 %v169_v41, 0.0 }
 0x113   :  { %256 = vmatmul.msk.f32.vlgmr.msrb.gmra.mxu0 %vm171_vm3, %v170_v42 }
 0x190   :  { %v192_v47 = vpop.f32.mrf.mxu0 }
 0x191   :  { %v193_v48 = vadd.f32 %v192_v47, %v45_v46 }
 0x193   :  { %257 = vmatmul.msk.f32.vlgmr.msrb.gmra.mxu2 %vm121_vm2, %v193_v48  ;;  %258 = vmatmul.msk.f32.vlgmr.msrb.gmra.mxu3 %vm121_vm2, %v193_v48 }
 0x216   :  { %v215_v51 = vpop.f32.mrf.mxu2  ;;  %v235_v52 = vpop.f32.mrf.mxu3 }
 0x217   :  { %v216_v53 = vadd.f32 %v215_v51, %v46_v49  ;;  %v236_v54 = vadd.f32 %v235_v52, %v47_v50 }
 0x219   :  { %243 = vst.msk [vmem:[%s411_s2] sm:$0xff] %vm48_vm1, %v216_v53  ;;  %v238_v55 = vmul.f32 0.5, %v236_v54 }
 0x21a   :  { %244 = vst.msk [vmem:[%s411_s2 + $0x8] sm:$0xff] %vm48_vm1, %v236_v54 }
 0x21b   :  { %v239_v56 = vmul.f32 1.442695, %v238_v55 }
 0x21d   :  { %259 = vpow2.f32 %v239_v56 }
 0x223   :  { %v260_v58 = vpop.eup %259 }
 0x224   :  { %v241_v59 = vmul.f32 %v260_v58, %v14_v57  ;;  %246 = vst.msk [vmem:[%s411_s2 + $0x18] sm:$0xff] %vm48_vm1, %v260_v58 }
 0x226   :  { %v242_v60 = vadd.f32 %v241_v59, %v216_v53 }
 0x228   :  { %245 = vst.msk [vmem:[%s411_s2 + $0x10] sm:$0xff] %vm48_vm1, %v242_v60 }

</bundles_post_ra>
